<compile_context>
chip_gen: v7x
topology: tpu7x:2x2x1
jax: 0.10.0
libtpu: 0.0.40
codegen_flags: <defaults>
</compile_context>

<pallas_src>
import functools

import jax
import jax.numpy as jnp
from jax.experimental import pallas as pl
from jax.experimental.pallas import tpu as pltpu


def _round_up(x, m):
    return ((x + m - 1) // m) * m


def _message_kernel(tile_start_ref, tile_count_ref,           # scalar-prefetch (SMEM)
                    h0_ref, idx_ref, w2_ref, b2_ref, w3_ref, b3_ref,
                    out_ref, *, tile_r, matmul_dtype, activation_dtype):
    r = pl.program_id(0)
    e_step = pl.program_id(1)

    # Zero the resident accumulator at the start of the edge (reduction) axis.
    @pl.when(e_step == 0)
    def _():
        out_ref[...] = jnp.zeros_like(out_ref)

    # Only process edge tiles that actually belong to this receiver tile.
    @pl.when(e_step < tile_count_ref[r])
    def _():
        tile_e = h0_ref.shape[0]

        # Layer-1 pre-activation was formed at node granularity in the wrapper;
        # the kernel starts with its SiLU.
        h = h0_ref[...].astype(activation_dtype)                 # [tile_e, hp]
        h = h * jax.nn.sigmoid(h)                                # SiLU

        # Layer-2 Linear + SiLU (bf16 MXU inputs, f32 accumulation).
        msg = jnp.dot(h.astype(matmul_dtype), w2_ref[...],
                      preferred_element_type=jnp.float32) + b2_ref[...]
        msg = msg.astype(activation_dtype)
        msg = msg * jax.nn.sigmoid(msg)                          # [tile_e, hp]

        # edge_inf_mlp: Linear(H, 1) + Sigmoid as a lane reduction.
        logits = (jnp.sum(msg * w3_ref[...].astype(activation_dtype),
                          axis=-1, keepdims=True) + b3_ref[0, 0])
        weighted = msg * jax.nn.sigmoid(logits)                  # [tile_e, hp]

        # scatter_add into this receiver tile via one-hot @ weighted (MXU matmul).
        # Edges outside [row0, row0 + tile_r) — neighbours' edges in a shared
        # boundary tile or sentinel-padded edges — match no row.
        local_idx = idx_ref[...] - r * tile_r                    # [1, tile_e] (cheap)
        rows = jax.lax.broadcasted_iota(jnp.int32, (tile_r, tile_e), 0)
        onehot = (rows == local_idx).astype(matmul_dtype)        # [tile_r, tile_e]
        out_ref[...] += jnp.dot(onehot, weighted.astype(matmul_dtype),
                                preferred_element_type=jnp.float32)


def init_params(key, num_hidden, num_inv):
    """Deterministic parameter init (weights stored as [in, out], i.e. W.T of PyTorch)."""
    k1, k2, k3, k4, k5, k6 = jax.random.split(key, 6)
    d_in = 2 * num_hidden + num_inv
    s1 = 1.0 / jnp.sqrt(d_in)
    s2 = 1.0 / jnp.sqrt(num_hidden)
    return dict(
        w1=jax.random.uniform(k1, (d_in, num_hidden), jnp.float32, -s1, s1),
        b1=jax.random.uniform(k2, (1, num_hidden), jnp.float32, -s1, s1),
        w2=jax.random.uniform(k3, (num_hidden, num_hidden), jnp.float32, -s2, s2),
        b2=jax.random.uniform(k4, (1, num_hidden), jnp.float32, -s2, s2),
        w3=jax.random.uniform(k5, (1, num_hidden), jnp.float32, -s2, s2),  # Linear(H,1)
        b3=jax.random.uniform(k6, (1, 1), jnp.float32, -s2, s2),
    )


def message_layer(x, index, edge_attr, params, *,
                  tile_e=1024, tile_r=None, matmul_dtype=jnp.bfloat16,
                  activation_dtype=jnp.float32,
                  acc_vmem_budget_bytes=8 * 1024 * 1024):
    """Pallas-backed forward matching MessageLayer.forward semantics.

    Notes:
      * activation_dtype=jnp.bfloat16 recommended on v6e/v7x (bf16 VPU/EUP);
        keep the f32 default on v5e.
      * On v7x pass tile_r ~= n_rec/2 so both TensorCores get receiver tiles.
      * The edge-axis grid extent is derived from the concrete edge->receiver
        histogram, so call with concrete (non-traced) indices.
        TODO(synk): accept a static max-edge-tiles-per-receiver cap for jit use.
    """
    x_send, x_rec = x
    index_send, index_rec = index

    H = params["w2"].shape[0]
    n_rec = x_rec.shape[0]
    n_edges = edge_attr.shape[0]

    # ---- Layer-1 at node granularity (removes the [E, 2H+I] concat; cuts
    # first-layer FLOPs from O(E·(2H+I)·H) to O(N·H·H + E·I·H)).
    w1 = params["w1"].astype(jnp.float32)
    w1_send, w1_rec, w1_attr = w1[:H], w1[H:2 * H], w1[2 * H:]
    p_send = x_send.astype(jnp.float32) @ w1_send                 # [N_send, H]
    p_rec = x_rec.astype(jnp.float32) @ w1_rec                    # [N_rec, H]
    h0 = (p_send[index_send] + p_rec[index_rec]
          + edge_attr.astype(jnp.float32) @ w1_attr + params["b1"])   # [E, H]

    # ---- Sort edges by receiver so each receiver tile touches a contiguous
    # range of edge tiles (grouped-edge design).
    order = jnp.argsort(index_rec)
    idx_sorted = index_rec.astype(jnp.int32)[order]
    h0 = h0[order]

    # ---- Tiling / padding (lane-dense hidden dim, generation-safe tile sizes).
    hp = _round_up(H, 128)
    tile_e = max(128, min(tile_e, _round_up(max(n_edges, 1), 128)))
    e_pad = _round_up(max(n_edges, 1), tile_e)
    e_tiles = e_pad // tile_e

    if tile_r is None:
        budget_rows = max(256, (acc_vmem_budget_bytes // (hp * 4) // 256) * 256)
        tile_r = min(_round_up(n_rec, 8), budget_rows)
    tile_r = max(8, _round_up(min(tile_r, _round_up(n_rec, 8)), 8))
    r_pad = _round_up(n_rec, tile_r)
    r_tiles = r_pad // tile_r

    # Edge padding uses a sentinel receiver id that matches no row in any tile.
    sentinel = r_pad
    mm_bytes = jnp.dtype(matmul_dtype).itemsize
    h0 = jnp.pad(h0, ((0, e_pad - n_edges), (0, hp - H))).astype(matmul_dtype)  # bf16 stream
    idx = jnp.pad(idx_sorted, (0, e_pad - n_edges),
                  constant_values=sentinel).reshape(1, e_pad)

    w2 = jnp.pad(params["w2"].astype(jnp.float32),
                 ((0, hp - H), (0, hp - H))).astype(matmul_dtype)
    b2 = jnp.pad(params["b2"].astype(jnp.float32), ((0, 0), (0, hp - H)))
    w3 = jnp.pad(params["w3"].astype(jnp.float32), ((0, 0), (0, hp - H)))
    b3 = params["b3"].astype(jnp.float32).reshape(1, 1)

    # ---- Per-receiver-tile edge-tile ranges (scalar-prefetched to SMEM).
    bounds = jnp.arange(r_tiles + 1, dtype=jnp.int32) * tile_r
    edge_start = jnp.searchsorted(idx_sorted, bounds[:-1], side="left").astype(jnp.int32)
    edge_end = jnp.searchsorted(idx_sorted, bounds[1:], side="left").astype(jnp.int32)
    tile_start = (edge_start // tile_e).astype(jnp.int32)
    tile_count = jnp.where(edge_end > edge_start,
                           (edge_end - 1) // tile_e - tile_start + 1,
                           0).astype(jnp.int32)

    # Static edge-axis grid extent / visited-tile count (indices are concrete here).
    e_max = max(1, int(jnp.max(tile_count)))
    visited = max(1, int(jnp.sum(tile_count)))

    grid = (r_tiles, e_max)
    e_clamp = e_tiles - 1

    def _edge_block(r, e, ts, tc):
        # Clamp so skipped steps (e >= count) reuse the previous block -> no extra DMA.
        e_in = jnp.minimum(e, jnp.maximum(tc[r] - 1, 0))
        return jnp.minimum(ts[r] + e_in, e_clamp)

    h0_map = lambda r, e, ts, tc: (_edge_block(r, e, ts, tc), 0)
    idx_map = lambda r, e, ts, tc: (0, _edge_block(r, e, ts, tc))
    const_map = lambda r, e, ts, tc: (0, 0)
    out_map = lambda r, e, ts, tc: (r, 0)

    # ---- Compiler hints: explicit VMEM limit + cost estimate.
    est_vmem = (2 * tile_e * hp * mm_bytes          # h0 double buffer
                + 2 * tile_e * 4                    # idx double buffer
                + 2 * hp * hp * mm_bytes            # w2
                + 4 * hp * 4                        # b2 / w3
                + 2 * tile_r * hp * 4)              # resident accumulator
    vmem_limit = int(min(100 * 2**20, max(1.5 * est_vmem + 2 * 2**20, 16 * 2**20)))
    cost = pl.CostEstimate(
        flops=visited * tile_e * (2 * hp * hp + 2 * tile_r * hp + 8 * hp),
        transcendentals=visited * tile_e * (2 * hp + 1),
        bytes_accessed=(visited * tile_e * (hp * mm_bytes + 4)
                        + hp * hp * mm_bytes + r_pad * hp * 4),
    )

    kernel = functools.partial(_message_kernel, tile_r=tile_r,
                               matmul_dtype=matmul_dtype,
                               activation_dtype=activation_dtype)

    out = pl.pallas_call(
        kernel,
        out_shape=jax.ShapeDtypeStruct((r_pad, hp), jnp.float32),
        grid_spec=pltpu.PrefetchScalarGridSpec(
            num_scalar_prefetch=2,
            grid=grid,
            in_specs=[
                pl.BlockSpec((tile_e, hp), h0_map),                   # h0 edge tile (bf16)
                pl.BlockSpec((1, tile_e), idx_map),                   # sorted index_rec tile
                pl.BlockSpec((hp, hp), const_map),                    # w2 (resident)
                pl.BlockSpec((1, hp), const_map),                     # b2
                pl.BlockSpec((1, hp), const_map),                     # w3
                pl.BlockSpec((1, 1), const_map,
                             memory_space=pltpu.MemorySpace.SMEM),    # b3 scalar
            ],
            out_specs=pl.BlockSpec((tile_r, hp), out_map),
        ),
        compiler_params=pltpu.CompilerParams(
            dimension_semantics=("parallel", "arbitrary"),
            vmem_limit_bytes=vmem_limit),
        cost_estimate=cost,
    )(tile_start, tile_count, h0, idx, w2, b2, w3, b3)

    return out[:n_rec, :H]


def message_layer_ref(x, index, edge_attr, params):
    """Pure-JAX (f32) reference for correctness checking."""
    x_send, x_rec = x
    index_send, index_rec = index
    state = jnp.concatenate([x_send[index_send], x_rec[index_rec], edge_attr], axis=1)
    h = state @ params["w1"] + params["b1"]
    h = h * jax.nn.sigmoid(h)
    msg = h @ params["w2"] + params["b2"]
    msg = msg * jax.nn.sigmoid(msg)
    ew = jax.nn.sigmoid(jnp.sum(msg * params["w3"], axis=-1, keepdims=True) + params["b3"])
    weighted = msg * ew
    out = jnp.zeros((x_rec.shape[0], msg.shape[1]), jnp.float32)
    return out.at[index_rec].add(weighted)


if __name__ == "__main__":
    num_hidden, num_inv = 32, 8

    def run_case(key, n_send, n_rec, n_edges, **kw):
        kp, kxs, kxr, kis, kir, kea = jax.random.split(key, 6)
        params = init_params(kp, num_hidden, num_inv)
        x_send = jax.random.normal(kxs, (n_send, num_hidden), jnp.float32)
        x_rec = jax.random.normal(kxr, (n_rec, num_hidden), jnp.float32)
        index_send = jax.random.randint(kis, (n_edges,), 0, n_send, jnp.int32)
        index_rec = jax.random.randint(kir, (n_edges,), 0, n_rec, jnp.int32)
        edge_attr = jax.random.normal(kea, (n_edges, num_inv), jnp.float32)

        out = message_layer((x_send, x_rec), (index_send, index_rec), edge_attr,
                            params, **kw)
        out = jax.block_until_ready(out)
        ref = message_layer_ref((x_send, x_rec), (index_send, index_rec),
                                edge_attr, params)
        assert out.shape == (n_rec, num_hidden)
        # bf16 MXU inputs / bf16 h0 stream with f32 accumulation -> tolerance-level equality.
        assert jnp.allclose(out, ref, atol=3e-2, rtol=3e-2), (
            f"mismatch vs JAX reference (max abs err "
            f"{float(jnp.max(jnp.abs(out - ref)))})")

    key = jax.random.PRNGKey(0)
    k1, k2 = jax.random.split(key)

    # Small case: single receiver tile, single edge tile.
    run_case(k1, n_send=8, n_rec=8, n_edges=16)

    # Multi-tile case (addresses the review's coverage concern): several receiver
    # tiles, several edge tiles, boundary edge tiles shared between receiver tiles,
    # sentinel-padded edges, skipped (count-exhausted) grid steps, e_step>0 accumulation.
    run_case(k2, n_send=12, n_rec=40, n_edges=300, tile_e=128, tile_r=16)

    print("KERNEL_OK")
</pallas_src>

<mosaic_0001>
module attributes {stable_mosaic.version = 11 : i64} {
  func.func @_message_kernel(%arg0: i32, %arg1: i32, %arg2: memref<1xi32, #tpu.memory_space<smem>>, %arg3: memref<1xi32, #tpu.memory_space<smem>>, %arg4: memref<128x128xbf16, #tpu.memory_space<vmem>>, %arg5: memref<1x128xi32, #tpu.memory_space<vmem>>, %arg6: memref<128x128xbf16, #tpu.memory_space<vmem>>, %arg7: memref<1x128xf32, #tpu.memory_space<vmem>>, %arg8: memref<1x128xf32, #tpu.memory_space<vmem>>, %arg9: memref<1x1xf32, #tpu.memory_space<smem>>, %arg10: memref<8x128xf32, #tpu.memory_space<vmem>>) attributes {dimension_semantics = [#tpu.dimension_semantics<parallel>, #tpu.dimension_semantics<arbitrary>], iteration_bounds = array<i64: 1, 1>, scalar_prefetch = 2 : i64, scratch_operands = 0 : i64, tpu.core_type = #tpu.core_type<tc>, window_params = [{transform_indices = @transform_0, window_bounds = array<i64: 128, 128>}, {transform_indices = @transform_1, window_bounds = array<i64: 1, 128>}, {pipeline_mode = #tpu.pipeline_mode<synchronous>, transform_indices = @transform_2, window_bounds = array<i64: 128, 128>}, {pipeline_mode = #tpu.pipeline_mode<synchronous>, transform_indices = @transform_3, window_bounds = array<i64: 1, 128>}, {pipeline_mode = #tpu.pipeline_mode<synchronous>, transform_indices = @transform_4, window_bounds = array<i64: 1, 128>}, {transform_indices = @transform_5, window_bounds = array<i64: 1, 1>}, {transform_indices = @transform_6, window_bounds = array<i64: 8, 128>}]} {
    %c0_i32 = arith.constant 0 : i32
    %0 = arith.cmpi eq, %arg1, %c0_i32 : i32
    %1 = arith.extui %0 : i1 to i32
    %c0_i32_0 = arith.constant 0 : i32
    %2 = arith.cmpi ne, %1, %c0_i32_0 : i32
    scf.if %2 {
      %cst = arith.constant 0.000000e+00 : f32
      %8 = vector.broadcast %cst : f32 to vector<8x128xf32>
      %c0 = arith.constant 0 : index
      %c0_2 = arith.constant 0 : index
      %9 = vector.load %arg10[%c0, %c0_2] : memref<8x128xf32, #tpu.memory_space<vmem>>, vector<8x128xf32>
      tpu.vector_store %arg10[%c0, %c0_2], %8 {strides = array<i32>} : memref<8x128xf32, #tpu.memory_space<vmem>>, vector<8x128xf32>,
    } else {
    }
    %3 = arith.index_cast %arg0 : i32 to index
    %4 = memref.load %arg3[%3] : memref<1xi32, #tpu.memory_space<smem>>
    %5 = arith.cmpi slt, %arg1, %4 : i32
    %6 = arith.extui %5 : i1 to i32
    %c0_i32_1 = arith.constant 0 : i32
    %7 = arith.cmpi ne, %6, %c0_i32_1 : i32
    scf.if %7 {
      %c0 = arith.constant 0 : index
      %c0_2 = arith.constant 0 : index
      %8 = vector.load %arg4[%c0, %c0_2] : memref<128x128xbf16, #tpu.memory_space<vmem>>, vector<128x128xbf16>
      %9 = arith.extf %8 : vector<128x128xbf16> to vector<128x128xf32>
      %10 = arith.negf %9 : vector<128x128xf32>
      %11 = math.exp %10 : vector<128x128xf32>
      %cst = arith.constant 1.000000e+00 : f32
      %12 = vector.broadcast %cst : f32 to vector<128x128xf32>
      %13 = arith.addf %12, %11 : vector<128x128xf32>
      %14 = arith.divf %12, %13 : vector<128x128xf32>
      %15 = arith.mulf %9, %14 : vector<128x128xf32>
      %16 = arith.truncf %15 : vector<128x128xf32> to vector<128x128xbf16>
      %c0_3 = arith.constant 0 : index
      %c0_4 = arith.constant 0 : index
      %17 = vector.load %arg6[%c0_3, %c0_4] : memref<128x128xbf16, #tpu.memory_space<vmem>>, vector<128x128xbf16>
      %cst_5 = arith.constant dense<0.000000e+00> : vector<128x128xf32>
      %18 = tpu.matmul %16, %17, %cst_5 {dimension_numbers = #tpu.dot_dimension_numbers<[1], [0], [0], [1], [0, 0, 1, 1], [], []>} : vector<128x128xbf16>, vector<128x128xbf16>, vector<128x128xf32> -> vector<128x128xf32>
      %c0_6 = arith.constant 0 : index
      %c0_7 = arith.constant 0 : index
      %19 = vector.load %arg7[%c0_6, %c0_7] : memref<1x128xf32, #tpu.memory_space<vmem>>, vector<1x128xf32>
      %20 = vector.broadcast %19 : vector<1x128xf32> to vector<128x128xf32>
      %21 = arith.addf %18, %20 : vector<128x128xf32>
      %22 = arith.negf %21 : vector<128x128xf32>
      %23 = math.exp %22 : vector<128x128xf32>
      %cst_8 = arith.constant 1.000000e+00 : f32
      %24 = vector.broadcast %cst_8 : f32 to vector<128x128xf32>
      %25 = arith.addf %24, %23 : vector<128x128xf32>
      %26 = arith.divf %24, %25 : vector<128x128xf32>
      %27 = arith.mulf %21, %26 : vector<128x128xf32>
      %c0_9 = arith.constant 0 : index
      %c0_10 = arith.constant 0 : index
      %28 = vector.load %arg8[%c0_9, %c0_10] : memref<1x128xf32, #tpu.memory_space<vmem>>, vector<1x128xf32>
      %29 = vector.broadcast %28 : vector<1x128xf32> to vector<128x128xf32>
      %30 = arith.mulf %27, %29 : vector<128x128xf32>
      %cst_11 = arith.constant dense<0.000000e+00> : vector<128xf32>
      %31 = vector.multi_reduction <add>, %30, %cst_11 [1] : vector<128x128xf32> to vector<128xf32>
      %32 = vector.shape_cast %31 : vector<128xf32> to vector<128x1xf32>
      %c0_12 = arith.constant 0 : index
      %c0_13 = arith.constant 0 : index
      %33 = memref.load %arg9[%c0_12, %c0_13] : memref<1x1xf32, #tpu.memory_space<smem>>
      %34 = vector.broadcast %33 : f32 to vector<128x1xf32>
      %35 = arith.addf %32, %34 : vector<128x1xf32>
      %36 = arith.negf %35 : vector<128x1xf32>
      %37 = math.exp %36 : vector<128x1xf32>
      %cst_14 = arith.constant 1.000000e+00 : f32
      %38 = vector.broadcast %cst_14 : f32 to vector<128x1xf32>
      %39 = arith.addf %38, %37 : vector<128x1xf32>
      %40 = arith.divf %38, %39 : vector<128x1xf32>
      %41 = vector.broadcast %40 : vector<128x1xf32> to vector<128x128xf32>
      %42 = arith.mulf %27, %41 : vector<128x128xf32>
      %c0_15 = arith.constant 0 : index
      %c0_16 = arith.constant 0 : index
      %43 = vector.load %arg5[%c0_15, %c0_16] : memref<1x128xi32, #tpu.memory_space<vmem>>, vector<1x128xi32>
      %c8_i32 = arith.constant 8 : i32
      %44 = arith.muli %arg0, %c8_i32 : i32
      %45 = vector.broadcast %44 : i32 to vector<1x128xi32>
      %46 = arith.subi %43, %45 : vector<1x128xi32>
      %47 = tpu.iota {dimensions = array<i32: 0>} : vector<8x128xi32>
      %48 = vector.broadcast %46 : vector<1x128xi32> to vector<8x128xi32>
      %49 = arith.cmpi eq, %47, %48 : vector<8x128xi32>
      %50 = arith.extui %49 : vector<8x128xi1> to vector<8x128xi32>
      %51 = arith.sitofp %50 : vector<8x128xi32> to vector<8x128xf32>
      %52 = arith.truncf %51 : vector<8x128xf32> to vector<8x128xbf16>
      %c0_17 = arith.constant 0 : index
      %c0_18 = arith.constant 0 : index
      %53 = vector.load %arg10[%c0_17, %c0_18] : memref<8x128xf32, #tpu.memory_space<vmem>>, vector<8x128xf32>
      %54 = arith.truncf %42 : vector<128x128xf32> to vector<128x128xbf16>
      %cst_19 = arith.constant dense<0.000000e+00> : vector<8x128xf32>
      %55 = tpu.matmul %52, %54, %cst_19 {dimension_numbers = #tpu.dot_dimension_numbers<[1], [0], [0], [1], [0, 0, 1, 1], [], []>} : vector<8x128xbf16>, vector<128x128xbf16>, vector<8x128xf32> -> vector<8x128xf32>
      %56 = arith.addf %53, %55 : vector<8x128xf32>
      %c0_20 = arith.constant 0 : index
      %c0_21 = arith.constant 0 : index
      %57 = vector.load %arg10[%c0_20, %c0_21] : memref<8x128xf32, #tpu.memory_space<vmem>>, vector<8x128xf32>
      tpu.vector_store %arg10[%c0_20, %c0_21], %56 {strides = array<i32>} : memref<8x128xf32, #tpu.memory_space<vmem>>, vector<8x128xf32>,
    } else {
    }
    return
  }
  func.func @transform_0(%arg0: i32, %arg1: i32, %arg2: memref<1xi32, #tpu.memory_space<smem>>, %arg3: memref<1xi32, #tpu.memory_space<smem>>) -> (i32, i32) {
    %0 = arith.index_cast %arg0 : i32 to index
    %1 = memref.load %arg3[%0] : memref<1xi32, #tpu.memory_space<smem>>
    %c1_i32 = arith.constant 1 : i32
    %2 = arith.subi %1, %c1_i32 : i32
    %c0_i32 = arith.constant 0 : i32
    %3 = arith.maxsi %2, %c0_i32 : i32
    %4 = arith.minsi %arg1, %3 : i32
    %5 = arith.index_cast %arg0 : i32 to index
    %6 = memref.load %arg2[%5] : memref<1xi32, #tpu.memory_space<smem>>
    %7 = arith.addi %6, %4 : i32
    %c0_i32_0 = arith.constant 0 : i32
    %8 = arith.minsi %7, %c0_i32_0 : i32
    %c0_i32_1 = arith.constant 0 : i32
    %c0_i32_2 = arith.constant 0 : i32
    return %8, %c0_i32_1 : i32, i32
  }
  func.func @transform_1(%arg0: i32, %arg1: i32, %arg2: memref<1xi32, #tpu.memory_space<smem>>, %arg3: memref<1xi32, #tpu.memory_space<smem>>) -> (i32, i32) {
    %0 = arith.index_cast %arg0 : i32 to index
    %1 = memref.load %arg3[%0] : memref<1xi32, #tpu.memory_space<smem>>
    %c1_i32 = arith.constant 1 : i32
    %2 = arith.subi %1, %c1_i32 : i32
    %c0_i32 = arith.constant 0 : i32
    %3 = arith.maxsi %2, %c0_i32 : i32
    %4 = arith.minsi %arg1, %3 : i32
    %5 = arith.index_cast %arg0 : i32 to index
    %6 = memref.load %arg2[%5] : memref<1xi32, #tpu.memory_space<smem>>
    %7 = arith.addi %6, %4 : i32
    %c0_i32_0 = arith.constant 0 : i32
    %8 = arith.minsi %7, %c0_i32_0 : i32
    %c0_i32_1 = arith.constant 0 : i32
    %c0_i32_2 = arith.constant 0 : i32
    return %c0_i32_1, %8 : i32, i32
  }
  func.func @transform_2(%arg0: i32, %arg1: i32, %arg2: memref<1xi32, #tpu.memory_space<smem>>, %arg3: memref<1xi32, #tpu.memory_space<smem>>) -> (i32, i32) {
    %c0_i32 = arith.constant 0 : i32
    %c0_i32_0 = arith.constant 0 : i32
    %c0_i32_1 = arith.constant 0 : i32
    return %c0_i32, %c0_i32_0 : i32, i32
  }
  func.func @transform_3(%arg0: i32, %arg1: i32, %arg2: memref<1xi32, #tpu.memory_space<smem>>, %arg3: memref<1xi32, #tpu.memory_space<smem>>) -> (i32, i32) {
    %c0_i32 = arith.constant 0 : i32
    %c0_i32_0 = arith.constant 0 : i32
    %c0_i32_1 = arith.constant 0 : i32
    return %c0_i32, %c0_i32_0 : i32, i32
  }
  func.func @transform_4(%arg0: i32, %arg1: i32, %arg2: memref<1xi32, #tpu.memory_space<smem>>, %arg3: memref<1xi32, #tpu.memory_space<smem>>) -> (i32, i32) {
    %c0_i32 = arith.constant 0 : i32
    %c0_i32_0 = arith.constant 0 : i32
    %c0_i32_1 = arith.constant 0 : i32
    return %c0_i32, %c0_i32_0 : i32, i32
  }
  func.func @transform_5(%arg0: i32, %arg1: i32, %arg2: memref<1xi32, #tpu.memory_space<smem>>, %arg3: memref<1xi32, #tpu.memory_space<smem>>) -> (i32, i32) {
    %c0_i32 = arith.constant 0 : i32
    %c0_i32_0 = arith.constant 0 : i32
    %c0_i32_1 = arith.constant 0 : i32
    return %c0_i32, %c0_i32_0 : i32, i32
  }
  func.func @transform_6(%arg0: i32, %arg1: i32, %arg2: memref<1xi32, #tpu.memory_space<smem>>, %arg3: memref<1xi32, #tpu.memory_space<smem>>) -> (i32, i32) {
    %c0_i32 = arith.constant 0 : i32
    %c0_i32_0 = arith.constant 0 : i32
    return %arg0, %c0_i32 : i32, i32
  }
}

</mosaic_0001>

<bundles_post_ra>
// kernel: tpu_custom_call.1
= control target key start
LH: loop header
LB: loop body
LE: loop exit
PB: predicated region body
PF: predicated region fallthrough
CT: control target
= control target key end

     0   :  { %s1744_s0 = inlined_call_operand.<no memory space> [shape: s32[1], index: 0, kind: input, shape index: {}]   ;;  %s1745_s1 = inlined_call_operand.<no memory space> [shape: s32[1], index: 1, kind: input, shape index: {}]   ;;  %s1746_s2 = inlined_call_operand.hbm [shape: bf16[128,128], index: 2, kind: input, shape index: {}]   ;;  %s1747_s3 = inlined_call_operand.vmem [shape: s32[1,128], index: 3, kind: input, shape index: {}]   ;;  %s1748_s4 = inlined_call_operand.hbm [shape: bf16[128,128], index: 4, kind: input, shape index: {}]   ;;  %s1749_s5 = inlined_call_operand.vmem [shape: f32[1,128], index: 5, kind: input, shape index: {}]   ;;  %s1750_s6 = inlined_call_operand.vmem [shape: f32[1,128], index: 6, kind: input, shape index: {}]   ;;  %s1751_s7 = inlined_call_operand.<no memory space> [shape: f32[1,1], index: 7, kind: input, shape index: {}]   ;;  %s1752_s8 = inlined_call_operand.hbm [shape: f32[8,128], index: 8, kind: output, shape index: {}]  }
   0x1   :  { %15 = sst [smem:[#allocation5]] %s1751_s7 }
   0x2   :  { %16 = vsyncpa [#allocation7], 0 }
   0x3   :  { %17 = vsyncpa [#allocation10], 0 }
   0x4   :  { %18 = vsyncpa [#allocation8], 0  ;;  %s854_s9 = sadd.s32 4294967295, %s1745_s1  ;;  %s1333_s10 = smov [#allocation9]  }
   0x5   :  { %p23_p0 = scmp.gt.s32.totalorder %s854_s9, 0  ;;  %s74_s11 = sshll.u32 %s1333_s10, 4  ;;  %s75_s11 = int_to_ptr.vmem [resolvable:$true] %s74_s11 }
   0x6   :  { %s1334_s7 = smov [#allocation6]   ;;  %s1259_s18 = scalar_lea.hbm %s1748_s4, 1024 }
   0x7   :  { %s1754_s9 = smov (!%p23_p0, %s854_s9), 0  ;;  %s37_s15 = sshll.u32 %s1334_s7, 4  ;;  %s38_s15 = int_to_ptr.vmem [resolvable:$true] %s37_s15 }
   0x8   :  { %s1756_s9 = smov (%p23_p0, %s1754_s9), 0  ;;  %p1260_p2 = scmp.ne.s32.totalorder %s1748_s4, %s1259_s18 }
   0x9   :  { %s1396_s14 = sadd.s32 %s1756_s9, %s1744_s0  ;;  %p1263_p3 = scmp.lt.u32.totalorder %s1259_s18, %s1748_s4 }
   0xa   :  { %p29_p1 = scmp.lt.s32.totalorder %s1396_s14, 0 }
   0xb   :  { %p1265_p4 = pnand %p1263_p3, %p1260_p2 }
   0xd   :  { %1268 = shalt.err (!%p1265_p4)
}
   0xe   :  { %s1269_s0 = scalar_lea.vmem %s75_s11, 1024  ;;  %p1274_p6 = scmp.lt.s32.totalorder %s75_s11, %s75_s11 }
   0xf   :  { %p1270_p5 = scmp.ne.s32.totalorder %s75_s11, %s1269_s0  ;;  %p1275_p7 = scmp.lt.s32.totalorder %s1269_s0, %s1269_s0 }
  0x11   :  { %p1276_p8 = por %p1275_p7, %p1274_p6 }
  0x13   :  { %p1277_p9 = pnand %p1276_p8, %p1270_p5 }
  0x15   :  { %1280 = shalt.err (!%p1277_p9)
}
  0x16   :  { %s1335_s23 = smov 64   ;;  %s1336_s24 = smov 4  }
  0x17   :  { %80 = dma.hbm_to_vmem [thread:$0]  %s1748_s4, 1024, %s75_s11, [#allocation10], %s1335_s23, %s1335_s23, %s1336_s24  }
  0x18   :  { %s30_s27 = scalar_select %p29_p1, %s1396_s14, 0 }
  0x19   :  { %s1283_s7 = scalar_lea.hbm %s1746_s2, 1024 }
  0x1a   :  { %s930_s28 = sshll.u32 %s30_s27, 10 }
  0x1b   :  { %s36_s9 = scalar_lea.hbm %s1746_s2, %s930_s28 }
  0x1c   :  { %s1281_s10 = scalar_lea.hbm %s36_s9, 1024  ;;  %p1284_p11 = scmp.lt.u32.totalorder %s36_s9, %s1746_s2 }
  0x1d   :  { %p1282_p10 = scmp.ne.s32.totalorder %s36_s9, %s1281_s10  ;;  %p1285_p12 = scmp.lt.u32.totalorder %s1283_s7, %s1281_s10 }
  0x1e   :  { %p1287_p0 = scmp.lt.u32.totalorder %s1281_s10, %s36_s9 }
  0x1f   :  { %p1286_p13 = por %p1285_p12, %p1284_p11 }
  0x21   :  { %p1288_p2 = por %p1287_p0, %p1286_p13 }
  0x23   :  { %p1289_p3 = pnand %p1288_p2, %p1282_p10 }
  0x25   :  { %1292 = shalt.err (!%p1289_p3)
}
  0x26   :  { %s1293_s4 = scalar_lea.vmem %s38_s15, 1024  ;;  %p1298_p5 = scmp.lt.s32.totalorder %s38_s15, %s38_s15 }
  0x27   :  { %p1294_p4 = scmp.ne.s32.totalorder %s38_s15, %s1293_s4  ;;  %p1299_p6 = scmp.lt.s32.totalorder %s1293_s4, %s1293_s4 }
  0x29   :  { %p1300_p7 = por %p1299_p6, %p1298_p5 }
  0x2b   :  { %p1301_p8 = pnand %p1300_p7, %p1294_p4 }
  0x2d   :  { %1304 = shalt.err (!%p1301_p8)
}
  0x2e   :  { %43 = dma.hbm_to_vmem [thread:$0]  %s36_s9, 1024, %s38_s15, [#allocation7], %s1335_s23, %s1335_s23, %s1336_s24  }
  0x2f   :  { %1327 = dma.done.wait [#allocation7], 1024  }
  0x30   :  { %1328 = vsyncadd [#allocation7], 4294966272 }
  0x31   :  { %1329 = dma.done.wait [#allocation10], 1024  }
  0x32   :  { %1330 = vsyncadd [#allocation10], 4294966272  ;;  %s1758_s27 = smov (!%p29_p1, %s30_s27), 0  ;;  %v1337_v0 = vmov 0.0   ;;  %p864_p9 = scmp.le.s32.totalorder %s1745_s1, 0 }
  0x33   :  { %145 = vst [vmem:[#allocation11] sm:$0xff] %v1337_v0  ;;  %s129_s18 = scalar_lea.vmem %s1747_s3, %s1758_s27  ;;  %v1059_v1 = vld [vmem:[#allocation9] sm:$0xff] (!%p864_p9)   ;;  %v1060_v2 = vld [vmem:[#allocation9 + $0x8] sm:$0xff] (!%p864_p9)   ;;  %v1061_v3 = vld [vmem:[#allocation9 + $0x10] sm:$0xff] (!%p864_p9)   ;;  %vm1339_vm0 = vmmov (!%p864_p9), 0  }
  0x34   :  { %150 = sbr.rel (%p864_p9) target bundleno = 758 (0x2f6), region = 41  ;;  %998 = vmatprep.subr.bf16.mxu0 (!%p864_p9), %v1059_v1  ;;  %v1062_v4 = vld [vmem:[#allocation9 + $0x18] sm:$0xff] (!%p864_p9)   ;;  %v1434_v5 = vld [vmem:[#allocation6] sm:$0xff] (!%p864_p9)   ;;  %v1436_v6 = vld [vmem:[#allocation6 + $0x8] sm:$0xff] (!%p864_p9)  }
  0x35   :  { %999 = vmatpush3.bf16.msra.mxu0 (!%p864_p9), %v1059_v1  ;;  %v1438_v7 = vld [vmem:[#allocation6 + $0x10] sm:$0xff] (!%p864_p9)   ;;  %v936_v8 = vunpack.c.l.bf16 (!%p864_p9), %v1434_v5  ;;  %v937_v9 = vunpack.c.h.bf16 (!%p864_p9), %v1434_v5  ;;  %v940_v10 = vunpack.c.l.bf16 (!%p864_p9), %v1436_v6  ;;  %v941_v11 = vunpack.c.h.bf16 (!%p864_p9), %v1436_v6  ;;  %v1444_v12 = vld [vmem:[#allocation6 + $0x18] sm:$0xff] (!%p864_p9)   ;;  %v1448_v15 = vld [vmem:[#allocation6 + $0x20] sm:$0xff] (!%p864_p9)  }
  0x36   :  { %1000 = vmatprep.subr.bf16.mxu0 (!%p864_p9), %v1060_v2  ;;  %v944_v13 = vunpack.c.l.bf16 (!%p864_p9), %v1438_v7  ;;  %v945_v14 = vunpack.c.h.bf16 (!%p864_p9), %v1438_v7  ;;  %v948_v19 = vunpack.c.l.bf16 (!%p864_p9), %v1444_v12  ;;  %v1063_v20 = vld [vmem:[#allocation9 + $0x20] sm:$0xff] (!%p864_p9)   ;;  %v949_v22 = vunpack.c.h.bf16 (!%p864_p9), %v1444_v12  ;;  %v1460_v23 = vld [vmem:[#allocation6 + $0x28] sm:$0xff] (!%p864_p9)   ;;  %v1468_v28 = vld [vmem:[#allocation6 + $0x30] sm:$0xff] (!%p864_p9)  }
  0x37   :  { %v865_v16 = vmul.f32 (!%p864_p9), -1.442695, %v936_v8  ;;  %v866_v17 = vmul.f32 (!%p864_p9), -1.442695, %v937_v9  ;;  %v867_v18 = vmul.f32 (!%p864_p9), -1.442695, %v940_v10  ;;  %v952_v25 = vunpack.c.l.bf16 (!%p864_p9), %v1448_v15 }
  0x38   :  { %v868_v21 = vmul.f32 (!%p864_p9), -1.442695, %v941_v11  ;;  %v869_v24 = vmul.f32 (!%p864_p9), -1.442695, %v944_v13  ;;  %v870_v26 = vmul.f32 (!%p864_p9), -1.442695, %v945_v14  ;;  %v953_v27 = vunpack.c.h.bf16 (!%p864_p9), %v1448_v15 }
  0x39   :  { %1001 = vmatpush3.bf16.msra.mxu0 (!%p864_p9), %v1060_v2  ;;  %1067 = vpow2.f32 (!%p864_p9), %v865_v16  ;;  %v871_v29 = vmul.f32 (!%p864_p9), -1.442695, %v948_v19  ;;  %v956_v30 = vunpack.c.l.bf16 (!%p864_p9), %v1460_v23  ;;  %v1064_v31 = vld [vmem:[#allocation9 + $0x28] sm:$0xff] (!%p864_p9)   ;;  %v872_v32 = vmul.f32 (!%p864_p9), -1.442695, %v949_v22  ;;  %v1065_v38 = vld [vmem:[#allocation9 + $0x30] sm:$0xff] (!%p864_p9)  }
  0x3a   :  { %1002 = vmatprep.subr.bf16.mxu0 (!%p864_p9), %v1061_v3  ;;  %1069 = vpow2.f32 (!%p864_p9), %v866_v17  ;;  %v957_v33 = vunpack.c.h.bf16 (!%p864_p9), %v1460_v23  ;;  %v873_v34 = vmul.f32 (!%p864_p9), -1.442695, %v952_v25  ;;  %v960_v35 = vunpack.c.l.bf16 (!%p864_p9), %v1468_v28  ;;  %v1066_v43 = vld [vmem:[#allocation9 + $0x38] sm:$0xff] (!%p864_p9)  }
  0x3b   :  { %1071 = vpow2.f32 %v867_v18  ;;  %v874_v36 = vmul.f32 -1.442695, %v953_v27  ;;  %v875_v37 = vmul.f32 -1.442695, %v956_v30  ;;  %v1487_v55 = vld [vmem:[#allocation6 + $0x38] sm:$0xff]   ;;  %v961_v58 = vunpack.c.h.bf16 %v1468_v28 }
  0x3c   :  { %1073 = vpow2.f32 %v868_v21  ;;  %v876_v39 = vmul.f32 -1.442695, %v957_v33  ;;  %v877_v40 = vmul.f32 -1.442695, %v960_v35  ;;  %v964_v63 = vunpack.c.l.bf16 %v1487_v55 }
  0x3d   :  { %1003 = vmatpush3.bf16.msra.mxu0 %v1061_v3  ;;  %1075 = vpow2.f32 %v869_v24  ;;  %v965_v2 = vunpack.c.h.bf16 %v1487_v55  ;;  %v878_v16 = vmul.f32 -1.442695, %v961_v58 }
  0x3e   :  { %1004 = vmatprep.subr.bf16.mxu0 %v1062_v4  ;;  %1077 = vpow2.f32 %v870_v26  ;;  %v879_v21 = vmul.f32 -1.442695, %v964_v63 }
  0x3f   :  { %1079 = vpow2.f32 %v871_v29  ;;  %v880_v29 = vmul.f32 -1.442695, %v965_v2 }
  0x40   :  { %1081 = vpow2.f32 %v872_v32 }
  0x41   :  { %1005 = vmatpush3.bf16.msra.mxu0 %v1062_v4  ;;  %1083 = vpow2.f32 %v873_v34 }
  0x42   :  { %1006 = vmatprep.subr.bf16.mxu0 %v1063_v20  ;;  %1085 = vpow2.f32 %v874_v36 }
  0x43   :  { %v1068_v41 = vpop.eup %1067  ;;  %1087 = vpow2.f32 %v875_v37 }
  0x44   :  { %v1070_v42 = vpop.eup %1069  ;;  %v231_v44 = vadd.f32 1.0, %v1068_v41  ;;  %1089 = vpow2.f32 %v876_v39 }
  0x45   :  { %1007 = vmatpush3.bf16.msra.mxu0 %v1063_v20  ;;  %v1072_v45 = vpop.eup %1071  ;;  %v232_v46 = vadd.f32 1.0, %v1070_v42  ;;  %1091 = vpow2.f32 %v877_v40 }
  0x46   :  { %1008 = vmatprep.subr.bf16.mxu0 %v1064_v31  ;;  %v1074_v47 = vpop.eup %1073  ;;  %1093 = vrcp.f32 %v231_v44  ;;  %v233_v48 = vadd.f32 1.0, %v1072_v45 }
  0x47   :  { %v1076_v49 = vpop.eup %1075  ;;  %1095 = vrcp.f32 %v232_v46  ;;  %v234_v50 = vadd.f32 1.0, %v1074_v47 }
  0x48   :  { %v1078_v51 = vpop.eup %1077  ;;  %1097 = vrcp.f32 %v233_v48  ;;  %v235_v52 = vadd.f32 1.0, %v1076_v49 }
  0x49   :  { %1009 = vmatpush3.bf16.msra.mxu0 %v1064_v31  ;;  %v1080_v53 = vpop.eup %1079  ;;  %1099 = vrcp.f32 %v234_v50  ;;  %v236_v54 = vadd.f32 1.0, %v1078_v51 }
  0x4a   :  { %1010 = vmatprep.subr.bf16.mxu0 %v1065_v38  ;;  %v1082_v56 = vpop.eup %1081  ;;  %1101 = vrcp.f32 %v235_v52  ;;  %v237_v57 = vadd.f32 1.0, %v1080_v53 }
  0x4b   :  { %v1084_v59 = vpop.eup %1083  ;;  %1103 = vrcp.f32 %v236_v54  ;;  %v238_v60 = vadd.f32 1.0, %v1082_v56 }
  0x4c   :  { %v1086_v61 = vpop.eup %1085  ;;  %1105 = vrcp.f32 %v237_v57  ;;  %v239_v62 = vadd.f32 1.0, %v1084_v59 }
  0x4d   :  { %1011 = vmatpush3.bf16.msra.mxu0 %v1065_v38  ;;  %v1088_v0 = vpop.eup %1087  ;;  %1107 = vrcp.f32 %v238_v60  ;;  %v240_v1 = vadd.f32 1.0, %v1086_v61 }
  0x4e   :  { %1012 = vmatprep.subr.bf16.mxu0 %v1066_v43  ;;  %v1090_v3 = vpop.eup %1089  ;;  %1109 = vrcp.f32 %v239_v62  ;;  %v241_v4 = vadd.f32 1.0, %v1088_v0 }
  0x4f   :  { %v1092_v17 = vpop.eup %1091  ;;  %1111 = vrcp.f32 %v240_v1  ;;  %v242_v18 = vadd.f32 1.0, %v1090_v3 }
  0x50   :  { %v1094_v20 = vpop.eup %1093  ;;  %1113 = vrcp.f32 %v241_v4 }
  0x51   :  { %1013 = vmatpush3.bf16.msra.mxu0 %v1066_v43  ;;  %v1096_v24 = vpop.eup %1095  ;;  %v279_v26 = vmul.f32 %v1094_v20, %v936_v8  ;;  %1115 = vpow2.f32 %v878_v16 }
  0x52   :  { %v1098_v31 = vpop.eup %1097  ;;  %v280_v32 = vmul.f32 %v1096_v24, %v937_v9  ;;  %1117 = vrcp.f32 %v242_v18 }
  0x53   :  { %v1100_v34 = vpop.eup %1099  ;;  %v281_v36 = vmul.f32 %v1098_v31, %v940_v10  ;;  %1119 = vpow2.f32 %v879_v21  ;;  %v243_v10 = vadd.f32 1.0, %v1092_v17 }
  0x54   :  { %v1102_v37 = vpop.eup %1101  ;;  %v295_v38 = vpack.c.bf16 %v280_v32, %v279_v26  ;;  %v282_v39 = vmul.f32 %v1100_v34, %v941_v11  ;;  %1121 = vpow2.f32 %v880_v29 }
  0x55   :  { %v1104_v8 = vpop.eup %1103  ;;  %v283_v40 = vmul.f32 %v1102_v37, %v944_v13  ;;  %1123 = vrcp.f32 %v243_v10 }
  0x56   :  { %v1106_v41 = vpop.eup %1105  ;;  %1014 = vmatprep.mubr.bf16.mxu0 %v295_v38  ;;  %v296_v5 = vpack.c.bf16 %v282_v39, %v281_v36  ;;  %v284_v9 = vmul.f32 %v1104_v8, %v945_v14 }
  0x57   :  { %v1108_v42 = vpop.eup %1107  ;;  %v285_v6 = vmul.f32 %v1106_v41, %v948_v19 }
  0x58   :  { %v1110_v43 = vpop.eup %1109  ;;  %1015 = vmatmul.mubr.bf16.vlgmr.msra.gmra.mrb[0].mxu0 %v296_v5  ;;  %v297_v44 = vpack.c.bf16 %v284_v9, %v283_v40  ;;  %v286_v11 = vmul.f32 %v1108_v42, %v949_v22 }
  0x59   :  { %v1112_v45 = vpop.eup %1111  ;;  %v287_v13 = vmul.f32 %v1110_v43, %v952_v25 }
  0x5a   :  { %1018 = vmatprep.mubr.bf16.mxu0 %v297_v44  ;;  %v288_v7 = vmul.f32 %v1112_v45, %v953_v27  ;;  %v1114_v14 = vpop.eup %1113  ;;  %v298_v47 = vpack.c.bf16 %v286_v11, %v285_v6 }
  0x5b   :  { %v1116_v46 = vpop.eup %1115  ;;  %v289_v22 = vmul.f32 %v1114_v14, %v956_v30 }
  0x5c   :  { %v1118_v48 = vpop.eup %1117  ;;  %v299_v49 = vpack.c.bf16 %v288_v7, %v287_v13  ;;  %v244_v50 = vadd.f32 1.0, %v1116_v46 }
  0x5d   :  { %v1120_v51 = vpop.eup %1119  ;;  %v290_v25 = vmul.f32 %v1118_v48, %v957_v33 }
  0x5e   :  { %v1122_v19 = vpop.eup %1121  ;;  %1125 = vrcp.f32 %v244_v50  ;;  %v245_v12 = vadd.f32 1.0, %v1120_v51 }
  0x5f   :  { %v246_v15 = vadd.f32 1.0, %v1122_v19  ;;  %v300_v27 = vpack.c.bf16 %v290_v25, %v289_v22  ;;  %v1124_v52 = vpop.eup %1123 }
  0x60   :  { %1019 = vmatmul.mubr.bf16.gmra.mrb[4].mxu0 %v298_v47  ;;  %1127 = vrcp.f32 %v245_v12  ;;  %v291_v53 = vmul.f32 %v1124_v52, %v960_v35  ;;  %v1533_v35 = vld [vmem:[%s1749_s5] ss:$0 sm:$0xff] }
  0x61   :  { %1022 = vmatprep.mubr.bf16.mxu0 %v299_v49  ;;  %1129 = vrcp.f32 %v246_v15 }
  0x68   :  { %1023 = vmatmul.mubr.bf16.gmra.mrb[8].mxu0 %v300_v27  ;;  %v1126_v54 = vpop.eup %1125 }
  0x69   :  { %v292_v56 = vmul.f32 %v1126_v54, %v961_v58 }
  0x6a   :  { %v1128_v57 = vpop.eup %1127 }
  0x6b   :  { %v1130_v59 = vpop.eup %1129  ;;  %v301_v30 = vpack.c.bf16 %v292_v56, %v291_v53  ;;  %v293_v23 = vmul.f32 %v1128_v57, %v964_v63 }
  0x6c   :  { %v294_v33 = vmul.f32 %v1130_v59, %v965_v2 }
  0x6d   :  { %1026 = vmatprep.mubr.bf16.mxu0 %v301_v30 }
  0x6e   :  { %v302_v60 = vpack.c.bf16 %v294_v33, %v293_v23  ;;  %v1596_v33 = vld [vmem:[%s1750_s6] ss:$0 sm:$0xff]  ;;  %s638_s6 = sld [smem:[#allocation5]] }
  0x70   :  { %1027 = vmatmul.mubr.bf16.gmra.mrb[12].mxu0 %v302_v60 }
 0x12b   :  { %v1016_v61 = vpop.f32.mrb[0].mxu0 }
 0x12c   :  { %v1536_v28 = vadd.f32 %v1016_v61, %v1533_v35  ;;  %v408_v58 = vpop.f32.mrb[1].mxu0 }
 0x12d   :  { %v1539_v62 = vadd.f32 %v1533_v35, %v408_v58  ;;  %v1017_v63 = vpop.f32.mrb[2].mxu0 }
 0x12e   :  { %v892_v55 = vmul.f32 -1.442695, %v1536_v28  ;;  %v1543_v0 = vadd.f32 %v1017_v63, %v1533_v35  ;;  %v411_v1 = vpop.f32.mrb[3].mxu0 }
 0x12f   :  { %v890_v2 = vmul.f32 -1.442695, %v1539_v62  ;;  %v1547_v3 = vadd.f32 %v1533_v35, %v411_v1 }
 0x130   :  { %1131 = vpow2.f32 %v892_v55  ;;  %v893_v4 = vmul.f32 -1.442695, %v1543_v0 }
 0x131   :  { %1133 = vpow2.f32 %v890_v2  ;;  %v891_v16 = vmul.f32 -1.442695, %v1547_v3 }
 0x132   :  { %1135 = vpow2.f32 %v893_v4 }
 0x133   :  { %1137 = vpow2.f32 %v891_v16  ;;  %v1020_v17 = vpop.f32.mrb[4].mxu0 }
 0x134   :  { %v1552_v18 = vadd.f32 %v1020_v17, %v1533_v35  ;;  %v424_v20 = vpop.f32.mrb[5].mxu0 }
 0x135   :  { %v1555_v21 = vadd.f32 %v1533_v35, %v424_v20  ;;  %v1021_v24 = vpop.f32.mrb[6].mxu0 }
 0x136   :  { %v896_v26 = vmul.f32 -1.442695, %v1552_v18  ;;  %v1559_v29 = vadd.f32 %v1021_v24, %v1533_v35  ;;  %v427_v31 = vpop.f32.mrb[7].mxu0 }
 0x137   :  { %v894_v32 = vmul.f32 -1.442695, %v1555_v21  ;;  %v1563_v34 = vadd.f32 %v1533_v35, %v427_v31 }
 0x138   :  { %1139 = vpow2.f32 %v896_v26  ;;  %v897_v36 = vmul.f32 -1.442695, %v1559_v29 }
 0x139   :  { %1141 = vpow2.f32 %v894_v32  ;;  %v895_v37 = vmul.f32 -1.442695, %v1563_v34 }
 0x13a   :  { %v1132_v38 = vpop.eup %1131  ;;  %1143 = vpow2.f32 %v897_v36 }
 0x13b   :  { %v1134_v39 = vpop.eup %1133  ;;  %v521_v8 = vadd.f32 1.0, %v1132_v38  ;;  %1145 = vpow2.f32 %v895_v37  ;;  %v1024_v40 = vpop.f32.mrb[8].mxu0 }
 0x13c   :  { %v1136_v41 = vpop.eup %1135  ;;  %v519_v5 = vadd.f32 1.0, %v1134_v39  ;;  %v1568_v9 = vadd.f32 %v1024_v40, %v1533_v35  ;;  %v440_v42 = vpop.f32.mrb[9].mxu0 }
 0x13d   :  { %v1138_v10 = vpop.eup %1137  ;;  %1147 = vrcp.f32 %v521_v8  ;;  %v522_v43 = vadd.f32 1.0, %v1136_v41  ;;  %v1571_v44 = vadd.f32 %v1533_v35, %v440_v42  ;;  %v1025_v6 = vpop.f32.mrb[10].mxu0 }
 0x13e   :  { %1149 = vrcp.f32 %v519_v5  ;;  %v520_v11 = vadd.f32 1.0, %v1138_v10  ;;  %v900_v45 = vmul.f32 -1.442695, %v1568_v9  ;;  %v1575_v13 = vadd.f32 %v1025_v6, %v1533_v35  ;;  %v443_v7 = vpop.f32.mrb[11].mxu0 }
 0x13f   :  { %1151 = vrcp.f32 %v522_v43  ;;  %v898_v14 = vmul.f32 -1.442695, %v1571_v44  ;;  %v1579_v46 = vadd.f32 %v1533_v35, %v443_v7 }
 0x140   :  { %1153 = vrcp.f32 %v520_v11  ;;  %v901_v47 = vmul.f32 -1.442695, %v1575_v13 }
 0x141   :  { %1155 = vpow2.f32 %v900_v45  ;;  %v899_v48 = vmul.f32 -1.442695, %v1579_v46 }
 0x142   :  { %v1140_v49 = vpop.eup %1139  ;;  %1157 = vpow2.f32 %v898_v14 }
 0x143   :  { %v1142_v50 = vpop.eup %1141  ;;  %v525_v51 = vadd.f32 1.0, %v1140_v49  ;;  %1159 = vpow2.f32 %v901_v47  ;;  %v1028_v22 = vpop.f32.mrb[12].mxu0 }
 0x144   :  { %v1144_v19 = vpop.eup %1143  ;;  %v523_v12 = vadd.f32 1.0, %v1142_v50  ;;  %1161 = vpow2.f32 %v899_v48  ;;  %v1584_v27 = vadd.f32 %v1028_v22, %v1533_v35  ;;  %v456_v52 = vpop.f32.mrb[13].mxu0 }
 0x145   :  { %v1146_v25 = vpop.eup %1145  ;;  %1163 = vrcp.f32 %v525_v51  ;;  %v526_v15 = vadd.f32 1.0, %v1144_v19  ;;  %v1587_v54 = vadd.f32 %v1533_v35, %v456_v52  ;;  %v1029_v56 = vpop.f32.mrb[14].mxu0 }
 0x146   :  { %1165 = vrcp.f32 %v523_v12  ;;  %v524_v53 = vadd.f32 1.0, %v1146_v25  ;;  %v904_v59 = vmul.f32 -1.442695, %v1584_v27  ;;  %v1591_v30 = vadd.f32 %v1029_v56, %v1533_v35  ;;  %v459_v23 = vpop.f32.mrb[15].mxu0 }
 0x147   :  { %v1148_v57 = vpop.eup %1147  ;;  %1167 = vrcp.f32 %v526_v15  ;;  %v902_v61 = vmul.f32 -1.442695, %v1587_v54  ;;  %v1600_v58 = vadd.f32 %v1533_v35, %v459_v23 }
 0x148   :  { %v1150_v60 = vpop.eup %1149  ;;  %1169 = vrcp.f32 %v524_v53  ;;  %v1603_v63 = vmul.f32 %v1148_v57, %v1536_v28  ;;  %v905_v1 = vmul.f32 -1.442695, %v1591_v30 }
 0x149   :  { %v1152_v55 = vpop.eup %1151  ;;  %1171 = vpow2.f32 %v904_v59  ;;  %v1607_v2 = vmul.f32 %v1150_v60, %v1539_v62  ;;  %v903_v17 = vmul.f32 -1.442695, %v1600_v58 }
 0x14a   :  { %v1154_v4 = vpop.eup %1153  ;;  %v1610_v16 = vmul.f32 %v1152_v55, %v1543_v0  ;;  %1173 = vpow2.f32 %v902_v61  ;;  %v592_v35 = vmul.f32 %v1596_v33, %v1603_v63 }
 0x14b   :  { %v1156_v20 = vpop.eup %1155  ;;  %v1616_v28 = vmul.f32 %v1154_v4, %v1547_v3  ;;  %1175 = vpow2.f32 %v905_v1  ;;  %v590_v24 = vmul.f32 %v1596_v33, %v1607_v2 }
 0x14c   :  { %v1158_v62 = vpop.eup %1157  ;;  %v529_v26 = vadd.f32 1.0, %v1156_v20  ;;  %1177 = vpow2.f32 %v903_v17  ;;  %610 = vadd.xlane.f32.xlu1 %v592_v35  ;;  %v593_v37 = vmul.f32 %v1596_v33, %v1610_v16 }
 0x14d   :  { %v1160_v0 = vpop.eup %1159  ;;  %v527_v31 = vadd.f32 1.0, %v1158_v62  ;;  %606 = vadd.xlane.f32.xlu0 %v590_v24  ;;  %v591_v39 = vmul.f32 %v1596_v33, %v1616_v28 }
 0x14e   :  { %v1162_v32 = vpop.eup %1161  ;;  %1179 = vrcp.f32 %v529_v26  ;;  %v530_v36 = vadd.f32 1.0, %v1160_v0 }
 0x14f   :  { %v1164_v38 = vpop.eup %1163  ;;  %1181 = vrcp.f32 %v527_v31  ;;  %v528_v3 = vadd.f32 1.0, %v1162_v32 }
 0x150   :  { %v1166_v8 = vpop.eup %1165  ;;  %1183 = vrcp.f32 %v530_v36  ;;  %612 = vadd.xlane.f32.xlu1 %v593_v37  ;;  %v1628_v10 = vmul.f32 %v1164_v38, %v1552_v18 }
 0x151   :  { %v1168_v40 = vpop.eup %1167  ;;  %v1625_v41 = vmul.f32 %v1166_v8, %v1555_v21  ;;  %1185 = vrcp.f32 %v528_v3  ;;  %608 = vadd.xlane.f32.xlu0 %v591_v39 }
 0x152   :  { %v1170_v5 = vpop.eup %1169  ;;  %v1636_v14 = vmul.f32 %v1168_v40, %v1559_v29  ;;  %v596_v49 = vmul.f32 %v1596_v33, %v1628_v10 }
 0x153   :  { %v1172_v42 = vpop.eup %1171  ;;  %v1631_v43 = vmul.f32 %v1170_v5, %v1563_v34  ;;  %v594_v6 = vmul.f32 %v1596_v33, %v1625_v41 }
 0x154   :  { %v1174_v11 = vpop.eup %1173  ;;  %v533_v45 = vadd.f32 1.0, %v1172_v42  ;;  %v597_v29 = vmul.f32 %v1596_v33, %v1636_v14 }
 0x155   :  { %v1176_v7 = vpop.eup %1175  ;;  %v531_v21 = vadd.f32 1.0, %v1174_v11  ;;  %614 = vadd.xlane.f32.xlu0 %v594_v6  ;;  %v595_v47 = vmul.f32 %v1596_v33, %v1631_v43 }
 0x156   :  { %v1178_v48 = vpop.eup %1177  ;;  %1187 = vrcp.f32 %v533_v45  ;;  %v534_v18 = vadd.f32 1.0, %v1176_v7 }
 0x157   :  { %1189 = vrcp.f32 %v531_v21  ;;  %v532_v34 = vadd.f32 1.0, %v1178_v48  ;;  %616 = vadd.xlane.f32.xlu1 %v595_v47 }
 0x158   :  { %v1180_v50 = vpop.eup %1179  ;;  %1191 = vrcp.f32 %v534_v18 }
 0x159   :  { %v1182_v51 = vpop.eup %1181  ;;  %1193 = vrcp.f32 %v532_v34  ;;  %618 = vadd.xlane.f32.xlu0 %v596_v49  ;;  %v1648_v25 = vmul.f32 %v1180_v50, %v1568_v9 }
 0x15a   :  { %v1184_v19 = vpop.eup %1183  ;;  %v1645_v12 = vmul.f32 %v1182_v51, %v1571_v44 }
 0x15b   :  { %v1186_v22 = vpop.eup %1185  ;;  %620 = vadd.xlane.f32.xlu1 %v597_v29  ;;  %v1656_v53 = vmul.f32 %v1184_v19, %v1575_v13  ;;  %v600_v57 = vmul.f32 %v1596_v33, %v1648_v25 }
 0x15c   :  { %v1651_v15 = vmul.f32 %v1186_v22, %v1579_v46  ;;  %v598_v52 = vmul.f32 %v1596_v33, %v1645_v12 }
 0x15d   :  { %v601_v23 = vmul.f32 %v1596_v33, %v1656_v53 }
 0x15e   :  { %622 = vadd.xlane.f32.xlu0 %v598_v52  ;;  %v599_v56 = vmul.f32 %v1596_v33, %v1651_v15 }
 0x160   :  { %v1188_v44 = vpop.eup %1187  ;;  %624 = vadd.xlane.f32.xlu1 %v599_v56 }
 0x161   :  { %v1190_v9 = vpop.eup %1189  ;;  %v1668_v60 = vmul.f32 %v1188_v44, %v1584_v27 }
 0x162   :  { %v1192_v59 = vpop.eup %1191  ;;  %v1663_v46 = vmul.f32 %v1190_v9, %v1587_v54  ;;  %626 = vadd.xlane.f32.xlu0 %v600_v57 }
 0x163   :  { %v1194_v13 = vpop.eup %1193  ;;  %v1676_v1 = vmul.f32 %v1192_v59, %v1591_v30  ;;  %v604_v4 = vmul.f32 %v1596_v33, %v1668_v60  ;;  %v1686_v30 = vstv %s638_s6 }
 0x164   :  { %v1671_v61 = vmul.f32 %v1194_v13, %v1600_v58  ;;  %628 = vadd.xlane.f32.xlu1 %v601_v23  ;;  %v602_v55 = vmul.f32 %v1596_v33, %v1663_v46  ;;  %v1338_v58 = vmov 0.0  }
 0x165   :  { %v605_v27 = vmul.f32 %v1596_v33, %v1676_v1  ;;  %1030 = vmatprep.subr.bf16.mxu1 %v1338_v58  ;;  %1046 = vmatprep.mubr.msk.bf16.mxu1 %vm1339_vm0, %v1338_v58 }
 0x166   :  { %630 = vadd.xlane.f32.xlu0 %v602_v55  ;;  %v603_v54 = vmul.f32 %v1596_v33, %v1671_v61 }
 0x168   :  { %632 = vadd.xlane.f32.xlu1 %v603_v54 }
 0x16a   :  { %634 = vadd.xlane.f32.xlu0 %v604_v4 }
 0x16c   :  { %636 = vadd.xlane.f32.xlu1 %v605_v27 }
 0x1d9   :  { %v611_v17 = vpop.xlane.xlu1 %610 }
 0x1da   :  { %v642_v35 = vadd.f32 %v1686_v30, %v611_v17  ;;  %v607_v20 = vpop.xlane.xlu0 %606 }
 0x1db   :  { %v640_v24 = vadd.f32 %v1686_v30, %v607_v20 }
 0x1dc   :  { %v909_v62 = vmul.f32 -1.442695, %v642_v35 }
 0x1dd   :  { %v907_v26 = vmul.f32 -1.442695, %v640_v24  ;;  %v613_v0 = vpop.xlane.xlu1 %612 }
 0x1de   :  { %1195 = vpow2.f32 %v909_v62  ;;  %v643_v33 = vadd.f32 %v1686_v30, %v613_v0  ;;  %v609_v31 = vpop.xlane.xlu0 %608 }
 0x1df   :  { %1197 = vpow2.f32 %v907_v26  ;;  %v641_v32 = vadd.f32 %v1686_v30, %v609_v31 }
 0x1e0   :  { %v910_v36 = vmul.f32 -1.442695, %v643_v33 }
 0x1e1   :  { %v908_v37 = vmul.f32 -1.442695, %v641_v32 }
 0x1e2   :  { %1199 = vpow2.f32 %v910_v36  ;;  %v615_v38 = vpop.xlane.xlu0 %614 }
 0x1e3   :  { %1201 = vpow2.f32 %v908_v37  ;;  %v644_v3 = vadd.f32 %v1686_v30, %v615_v38 }
 0x1e4   :  { %v617_v39 = vpop.xlane.xlu1 %616 }
 0x1e5   :  { %v911_v8 = vmul.f32 -1.442695, %v644_v3  ;;  %v645_v40 = vadd.f32 %v1686_v30, %v617_v39 }
 0x1e6   :  { %v619_v5 = vpop.xlane.xlu0 %618 }
 0x1e7   :  { %1203 = vpow2.f32 %v911_v8  ;;  %v912_v42 = vmul.f32 -1.442695, %v645_v40  ;;  %v646_v6 = vadd.f32 %v1686_v30, %v619_v5 }
 0x1e8   :  { %v1196_v11 = vpop.eup %1195  ;;  %v621_v45 = vpop.xlane.xlu1 %620 }
 0x1e9   :  { %v1198_v7 = vpop.eup %1197  ;;  %v706_v21 = vadd.f32 1.0, %v1196_v11  ;;  %1205 = vpow2.f32 %v912_v42  ;;  %v913_v47 = vmul.f32 -1.442695, %v646_v6  ;;  %v647_v48 = vadd.f32 %v1686_v30, %v621_v45 }
 0x1ea   :  { %v704_v18 = vadd.f32 1.0, %v1198_v7 }
 0x1eb   :  { %1207 = vrcp.f32 %v706_v21  ;;  %v914_v34 = vmul.f32 -1.442695, %v647_v48  ;;  %v623_v49 = vpop.xlane.xlu0 %622 }
 0x1ec   :  { %v1200_v50 = vpop.eup %1199  ;;  %1209 = vrcp.f32 %v704_v18  ;;  %v648_v51 = vadd.f32 %v1686_v30, %v623_v49 }
 0x1ed   :  { %v1202_v29 = vpop.eup %1201  ;;  %v707_v19 = vadd.f32 1.0, %v1200_v50  ;;  %1211 = vpow2.f32 %v913_v47  ;;  %v625_v22 = vpop.xlane.xlu1 %624 }
 0x1ee   :  { %v705_v52 = vadd.f32 1.0, %v1202_v29  ;;  %1213 = vpow2.f32 %v914_v34  ;;  %v915_v56 = vmul.f32 -1.442695, %v648_v51  ;;  %v649_v44 = vadd.f32 %v1686_v30, %v625_v22 }
 0x1ef   :  { %1215 = vrcp.f32 %v707_v19  ;;  %v627_v57 = vpop.xlane.xlu0 %626 }
 0x1f0   :  { %1217 = vrcp.f32 %v705_v52  ;;  %v916_v9 = vmul.f32 -1.442695, %v649_v44  ;;  %v650_v59 = vadd.f32 %v1686_v30, %v627_v57 }
 0x1f1   :  { %v1204_v23 = vpop.eup %1203  ;;  %1219 = vpow2.f32 %v915_v56  ;;  %v629_v13 = vpop.xlane.xlu1 %628 }
 0x1f2   :  { %v708_v55 = vadd.f32 1.0, %v1204_v23  ;;  %1221 = vpow2.f32 %v916_v9  ;;  %v917_v54 = vmul.f32 -1.442695, %v650_v59  ;;  %v651_v4 = vadd.f32 %v1686_v30, %v629_v13 }
 0x1f3   :  { %v1206_v27 = vpop.eup %1205  ;;  %v631_v17 = vpop.xlane.xlu0 %630 }
 0x1f4   :  { %1223 = vrcp.f32 %v708_v55  ;;  %v709_v35 = vadd.f32 1.0, %v1206_v27  ;;  %v918_v20 = vmul.f32 -1.442695, %v651_v4  ;;  %v652_v24 = vadd.f32 %v1686_v30, %v631_v17 }
 0x1f5   :  { %v1208_v62 = vpop.eup %1207  ;;  %1225 = vpow2.f32 %v917_v54  ;;  %v633_v26 = vpop.xlane.xlu1 %632 }
 0x1f6   :  { %v1210_v0 = vpop.eup %1209  ;;  %1227 = vrcp.f32 %v709_v35  ;;  %v919_v33 = vmul.f32 -1.442695, %v652_v24  ;;  %v653_v31 = vadd.f32 %v1686_v30, %v633_v26 }
 0x1f7   :  { %v1212_v32 = vpop.eup %1211  ;;  %1229 = vpow2.f32 %v918_v20  ;;  %v635_v36 = vpop.xlane.xlu0 %634  ;;  %v752_v7 = vmul.f32 %v1210_v0, %v1607_v2 }
 0x1f8   :  { %v1214_v37 = vpop.eup %1213  ;;  %v710_v38 = vadd.f32 1.0, %v1212_v32  ;;  %1231 = vpow2.f32 %v919_v33  ;;  %v920_v3 = vmul.f32 -1.442695, %v653_v31  ;;  %v654_v39 = vadd.f32 %v1686_v30, %v635_v36 }
 0x1f9   :  { %v1216_v8 = vpop.eup %1215  ;;  %v711_v40 = vadd.f32 1.0, %v1214_v37  ;;  %v637_v5 = vpop.xlane.xlu1 %636  ;;  %v772_v32 = vlaneseq }
 0x1fa   :  { %v1218_v42 = vpop.eup %1217  ;;  %1233 = vrcp.f32 %v710_v38  ;;  %v921_v6 = vmul.f32 -1.442695, %v654_v39  ;;  %v655_v11 = vadd.f32 %v1686_v30, %v637_v5  ;;  %v755_v50 = vmul.f32 %v1216_v8, %v1610_v16  ;;  %v782_v5 = vld [vmem:[#allocation11] sm:$0xff] }
 0x1fb   :  { %v1220_v45 = vpop.eup %1219  ;;  %1235 = vrcp.f32 %v711_v40  ;;  %v753_v21 = vmul.f32 %v1218_v42, %v1616_v28  ;;  %v754_v30 = vmul.f32 %v1208_v62, %v1603_v63 }
 0x1fc   :  { %v1222_v47 = vpop.eup %1221  ;;  %v712_v48 = vadd.f32 1.0, %v1220_v45  ;;  %1237 = vpow2.f32 %v920_v3  ;;  %v922_v18 = vmul.f32 -1.442695, %v655_v11  ;;  %v773_v3 = vshrl.u32 %v772_v32, 7 }
 0x1fd   :  { %v713_v34 = vadd.f32 1.0, %v1222_v47  ;;  %1239 = vpow2.f32 %v921_v6  ;;  %v783_v49 = vpack.c.bf16 %v753_v21, %v752_v7  ;;  %v784_v22 = vpack.c.bf16 %v755_v50, %v754_v30 }
 0x1fe   :  { %v1224_v51 = vpop.eup %1223  ;;  %1241 = vrcp.f32 %v712_v48 }
 0x1ff   :  { %v1226_v29 = vpop.eup %1225  ;;  %1243 = vrcp.f32 %v713_v34  ;;  %1031 = vmatpush3.bf16.msra.mxu1 %v783_v49  ;;  %v756_v57 = vmul.f32 %v1224_v51, %v1625_v41 }
 0x200   :  { %v1228_v19 = vpop.eup %1227  ;;  %v714_v2 = vadd.f32 1.0, %v1226_v29  ;;  %1245 = vpow2.f32 %v922_v18  ;;  %1032 = vmatprep.subr.bf16.mxu1 %v1338_v58 }
 0x201   :  { %v1230_v28 = vpop.eup %1229  ;;  %v757_v52 = vmul.f32 %v1228_v19, %v1631_v43 }
 0x202   :  { %v1232_v56 = vpop.eup %1231  ;;  %1247 = vrcp.f32 %v714_v2  ;;  %v715_v44 = vadd.f32 1.0, %v1230_v28 }
 0x203   :  { %v716_v16 = vadd.f32 1.0, %v1232_v56  ;;  %1033 = vmatpush3.bf16.msra.mxu1 %v784_v22  ;;  %v785_v59 = vpack.c.bf16 %v757_v52, %v756_v57 }
 0x204   :  { %v1234_v9 = vpop.eup %1233  ;;  %1249 = vrcp.f32 %v715_v44  ;;  %1034 = vmatprep.subr.bf16.mxu1 %v1338_v58 }
 0x205   :  { %v1236_v63 = vpop.eup %1235  ;;  %1251 = vrcp.f32 %v716_v16  ;;  %v758_v43 = vmul.f32 %v1234_v9, %v1628_v10 }
 0x206   :  { %v1238_v23 = vpop.eup %1237  ;;  %v759_v13 = vmul.f32 %v1236_v63, %v1636_v14 }
 0x207   :  { %v1240_v55 = vpop.eup %1239  ;;  %v717_v54 = vadd.f32 1.0, %v1238_v23  ;;  %1035 = vmatpush3.bf16.msra.mxu1 %v785_v59 }
 0x208   :  { %v1242_v4 = vpop.eup %1241  ;;  %v718_v27 = vadd.f32 1.0, %v1240_v55  ;;  %1036 = vmatprep.subr.bf16.mxu1 %v1338_v58  ;;  %v786_v17 = vpack.c.bf16 %v759_v13, %v758_v43 }
 0x209   :  { %v1244_v41 = vpop.eup %1243  ;;  %1253 = vrcp.f32 %v717_v54  ;;  %v760_v14 = vmul.f32 %v1242_v4, %v1645_v12 }
 0x20a   :  { %v1246_v35 = vpop.eup %1245  ;;  %v761_v20 = vmul.f32 %v1244_v41, %v1651_v15  ;;  %1255 = vrcp.f32 %v718_v27 }
 0x20b   :  { %v719_v24 = vadd.f32 1.0, %v1246_v35  ;;  %1037 = vmatpush3.bf16.msra.mxu1 %v786_v17 }
 0x20c   :  { %v1248_v62 = vpop.eup %1247  ;;  %1038 = vmatprep.subr.bf16.mxu1 %v1338_v58  ;;  %v787_v10 = vpack.c.bf16 %v761_v20, %v760_v14 }
 0x20d   :  { %1257 = vrcp.f32 %v719_v24  ;;  %v762_v0 = vmul.f32 %v1248_v62, %v1648_v25  ;;  %v923_v25 = vld [vmem:[%s129_s18] ss:$0 sm:$0xff] }
 0x20e   :  { %v1250_v26 = vpop.eup %1249  ;;  %vm778_vm1 = vcmp.eq.s32.totalorder %v773_v3, %v923_v25 }
 0x20f   :  { %1039 = vmatpush3.bf16.msra.mxu1 %v787_v10  ;;  %v763_v33 = vmul.f32 %v1250_v26, %v1656_v53  ;;  %v1252_v15 = vpop.eup %1251  ;;  %vm925_vm2 = vmpackc.low %vm778_vm1, %vm778_vm1 }
 0x210   :  { %1040 = vmatprep.subr.bf16.mxu1 %v1338_v58  ;;  %v764_v12 = vmul.f32 %v1252_v15, %v1663_v46 }
 0x211   :  { %v788_v31 = vpack.c.bf16 %v763_v33, %v762_v0 }
 0x213   :  { %v1254_v36 = vpop.eup %1253  ;;  %1041 = vmatpush3.bf16.msra.mxu1 %v788_v31 }
 0x214   :  { %1042 = vmatprep.subr.bf16.mxu1 %v1338_v58  ;;  %v765_v37 = vmul.f32 %v1254_v36, %v1671_v61  ;;  %v1256_v38 = vpop.eup %1255  ;;  %v1340_v61 = vmov 1.0|1.0  }
 0x215   :  { %v766_v8 = vmul.f32 %v1256_v38, %v1668_v60 }
 0x216   :  { %v789_v39 = vpack.c.bf16 %v765_v37, %v764_v12 }
 0x217   :  { %v1258_v53 = vpop.eup %1257 }
 0x218   :  { %1043 = vmatpush3.bf16.msra.mxu1 %v789_v39  ;;  %v767_v40 = vmul.f32 %v1258_v53, %v1676_v1 }
 0x219   :  { %1044 = vmatprep.subr.bf16.mxu1 %v1338_v58 }
 0x21a   :  { %v790_v46 = vpack.c.bf16 %v767_v40, %v766_v8 }
 0x21c   :  { %1045 = vmatpush3.bf16.msra.mxu1 %v790_v46 }
 0x21f   :  { %1047 = vmatmul.mubr.msk.bf16.vlgmr.msra.gmra.mrb[0].mxu1 %vm925_vm2, %v1340_v61 }
 0x2f2   :  { %v825_v42 = vpop.f32.mrb[0].mxu1 }
 0x2f3   :  { %v831_v6 = vadd.f32 %v825_v42, %v782_v5  ;;  %v1048_v11 = vpop.f32.mrb[1].mxu1 }
 0x2f4   :  { %v828_v45 = vpop.f32.mrb[2].mxu1 }
 0x2f5   :  { %832 = vst [vmem:[#allocation11] sm:$0xff] %v831_v6  ;;  %v1049_v7 = vpop.f32.mrb[3].mxu1 }
 0x2f6 PF:  { %s1341_s3 = smov [#allocation11]  }
 0x2f7   :  { %s839_s0 = sshll.u32 %s1341_s3, 4  ;;  %s840_s0 = int_to_ptr.vmem [resolvable:$true] %s839_s0 }
 0x2f8   :  { %s1305_s23 = scalar_lea.vmem %s840_s0, 128  ;;  %p1310_p10 = scmp.lt.s32.totalorder %s840_s0, %s840_s0 }
 0x2f9   :  { %p1306_p1 = scmp.ne.s32.totalorder %s840_s0, %s1305_s23  ;;  %p1311_p11 = scmp.lt.s32.totalorder %s1305_s23, %s1305_s23 }
 0x2fb   :  { %p1312_p12 = por %p1311_p11, %p1310_p10 }
 0x2fd   :  { %p1313_p13 = pnand %p1312_p12, %p1306_p1 }
 0x2ff   :  { %1316 = shalt.err (!%p1313_p13)
}
 0x300   :  { %s1317_s26 = scalar_lea.hbm %s1752_s8, 128 }
 0x301   :  { %p1318_p0 = scmp.ne.s32.totalorder %s1752_s8, %s1317_s26  ;;  %p1321_p2 = scmp.lt.u32.totalorder %s1317_s26, %s1752_s8 }
 0x303   :  { %p1323_p3 = pnand %p1321_p2, %p1318_p0 }
 0x305   :  { %1326 = shalt.err (!%p1323_p3)
}
 0x306   :  { %842 = dma.vmem_to_hbm [thread:$0]  %s840_s0, 128, %s1752_s8, [#allocation8]  }
 0x307   :  { %1331 = dma.done.wait [#allocation8], 128  }
 0x308   :  { %1332 = vsyncadd [#allocation8], 4294967168 }
 0x309   :  { %846 = vsyncpa [#allocation7], 1 }
 0x30a   :  { %847 = vsyncpa [#allocation10], 1 }
 0x30b   :  { %848 = vsyncpa [#allocation8], 1 }

</bundles_post_ra>
